<compile_context>
chip_gen: v5e
topology: v5e:2x2
jax: 0.10.0
libtpu: 0.0.40
codegen_flags: <defaults>
</compile_context>

<pallas_src>
import functools

import jax
import jax.numpy as jnp
from jax.experimental import pallas as pl
from jax.experimental.pallas import tpu as pltpu


def _apply_perm_kernel(pairs_ref, x_ref, o_ref, *, num_moved):
    """pairs_ref: SMEM (num_moved, 2) int32 with rows (dst_col, src_col);
    x_ref / o_ref: VMEM (TB, F).  Writes o[:, dst] = x[:, src] for every
    moved column, o = x elsewhere.  All extractions read the original tile,
    so the column reductions are independent of one another."""
    x = x_ref[...]
    _, f = x.shape
    lane = jax.lax.broadcasted_iota(jnp.int32, (1, f), 1)   # (1, F), cheap
    zero = jnp.zeros((), dtype=x.dtype)
    y = x
    # num_moved is a static Python int -> fully unrolled; duplicates among the
    # (dst, src) pairs just rewrite the same (correct) value.
    for s in range(num_moved):
        dst = pairs_ref[s, 0]
        src = pairs_ref[s, 1]
        src_mask = lane == src                              # (1, F)
        dst_mask = lane == dst                              # (1, F)
        # Column extraction without dynamic gather: mask + row reduce (XLU).
        col = jnp.sum(jnp.where(src_mask, x, zero), axis=1, keepdims=True)
        y = jnp.where(dst_mask, col, y)
    o_ref[...] = y


def _pick_batch_tile(b, f, dtype, target_bytes=2 * 1024 * 1024):
    """Batch tile: multiple of 8, ~2 MiB per tile -> double-buffered in+out
    tiles stay well under the default scoped VMEM on v5e/v6e/v7x."""
    if b <= 8:
        return int(b)
    itemsize = jnp.dtype(dtype).itemsize
    rows = (target_bytes // max(1, f * itemsize)) // 8 * 8
    rows = max(8, rows)
    rows = min(rows, ((b + 7) // 8) * 8)
    return int(rows)


def random_swap_features(x, swap_idx):
    """x: [B, F]; swap_idx: [num_swaps, 2] int32 (distinct pair per row)."""
    b, f = x.shape
    num_swaps = swap_idx.shape[0]

    # ---- Compose the sequential swaps into one permutation (cheap, on [F]).
    # p[j] = source column of output column j after all swaps are applied.
    p = jnp.arange(f, dtype=jnp.int32)
    for s in range(num_swaps):
        i1 = swap_idx[s, 0]
        i2 = swap_idx[s, 1]
        v1 = p[i1]
        v2 = p[i2]
        p = p.at[i1].set(v2).at[i2].set(v1)

    # Only columns mentioned in a swap can differ from identity.
    dsts = swap_idx.reshape(-1).astype(jnp.int32)           # (2*num_swaps,)
    srcs = jnp.take(p, dsts)                                # p[dst]
    pairs = jnp.stack([dsts, srcs], axis=1).astype(jnp.int32)
    num_moved = int(pairs.shape[0])

    tb = _pick_batch_tile(b, f, x.dtype)
    grid = (pl.cdiv(b, tb),)

    kernel = functools.partial(_apply_perm_kernel, num_moved=num_moved)
    cost = pl.CostEstimate(
        flops=0,
        transcendentals=0,
        bytes_accessed=int(2 * b * f * x.dtype.itemsize),
    )

    return pl.pallas_call(
        kernel,
        out_shape=jax.ShapeDtypeStruct((b, f), x.dtype),
        grid_spec=pltpu.PrefetchScalarGridSpec(
            num_scalar_prefetch=1,
            grid=grid,
            # Feature axis is never tiled (swap indices may address any column).
            in_specs=[pl.BlockSpec((tb, f), lambda i, pairs: (i, 0))],
            out_specs=pl.BlockSpec((tb, f), lambda i, pairs: (i, 0)),
        ),
        compiler_params=pltpu.CompilerParams(
            dimension_semantics=("parallel",)
        ),
        cost_estimate=cost,
    )(pairs, x)


def make_swap_indices(key, num_features, num_swaps):
    """Mimics random.sample(range(F), 2) per swap: a distinct pair each time."""
    pairs = []
    for s in range(num_swaps):
        k = jax.random.fold_in(key, s)
        pairs.append(
            jax.random.choice(k, num_features, shape=(2,), replace=False)
        )
    return jnp.stack(pairs).astype(jnp.int32)


def reference_swap(x, swap_idx):
    """Pure-JAX reference reproducing the PyTorch in-place swap loop."""
    y = x
    for s in range(swap_idx.shape[0]):
        i1, i2 = int(swap_idx[s, 0]), int(swap_idx[s, 1])
        c1 = y[:, i1]
        c2 = y[:, i2]
        y = y.at[:, i1].set(c2)
        y = y.at[:, i2].set(c1)
    return y


if __name__ == "__main__":
    key = jax.random.PRNGKey(0)
    B, F = 16, 128          # lane-dense feature axis (multiple of 128)
    NUM_SWAPS = 3

    k_data, k_idx = jax.random.split(key)
    x = jax.random.normal(k_data, (B, F), dtype=jnp.float32)
    swap_idx = make_swap_indices(k_idx, F, NUM_SWAPS)

    out = random_swap_features(x, swap_idx)
    out = jax.block_until_ready(out)

    ref = reference_swap(x, swap_idx)
    assert out.shape == x.shape and out.dtype == x.dtype
    assert jnp.allclose(out, ref), "kernel output mismatch vs reference"

    print("KERNEL_OK")
</pallas_src>

<mosaic_0001>
module attributes {stable_mosaic.version = 11 : i64} {
  func.func @_apply_perm_kernel(%arg0: i32, %arg1: memref<6x2xi32, #tpu.memory_space<smem>>, %arg2: memref<16x128xf32, #tpu.memory_space<vmem>>, %arg3: memref<16x128xf32, #tpu.memory_space<vmem>>) attributes {dimension_semantics = [#tpu.dimension_semantics<parallel>], iteration_bounds = array<i64: 1>, scalar_prefetch = 1 : i64, scratch_operands = 0 : i64, tpu.core_type = #tpu.core_type<tc>, window_params = [{transform_indices = @transform_0, window_bounds = array<i64: 16, 128>}, {transform_indices = @transform_1, window_bounds = array<i64: 16, 128>}]} {
    %c0 = arith.constant 0 : index
    %c0_0 = arith.constant 0 : index
    %0 = vector.load %arg2[%c0, %c0_0] : memref<16x128xf32, #tpu.memory_space<vmem>>, vector<16x128xf32>
    %1 = tpu.iota {dimensions = array<i32: 1>} : vector<1x128xi32>
    %c0_1 = arith.constant 0 : index
    %c0_2 = arith.constant 0 : index
    %2 = memref.load %arg1[%c0_1, %c0_2] : memref<6x2xi32, #tpu.memory_space<smem>>
    %c0_3 = arith.constant 0 : index
    %c1 = arith.constant 1 : index
    %3 = memref.load %arg1[%c0_3, %c1] : memref<6x2xi32, #tpu.memory_space<smem>>
    %4 = vector.broadcast %3 : i32 to vector<1x128xi32>
    %5 = arith.cmpi eq, %1, %4 : vector<1x128xi32>
    %6 = vector.broadcast %2 : i32 to vector<1x128xi32>
    %7 = arith.cmpi eq, %1, %6 : vector<1x128xi32>
    %cst = arith.constant 0.000000e+00 : f32
    %8 = vector.shape_cast %5 : vector<1x128xi1> to vector<1x128xi1>
    %9 = vector.broadcast %8 : vector<1x128xi1> to vector<16x128xi1>
    %10 = vector.broadcast %cst : f32 to vector<16x128xf32>
    %11 = arith.select %9, %0, %10 : vector<16x128xi1>, vector<16x128xf32>
    %cst_4 = arith.constant dense<0.000000e+00> : vector<16xf32>
    %12 = vector.multi_reduction <add>, %11, %cst_4 [1] : vector<16x128xf32> to vector<16xf32>
    %13 = vector.shape_cast %12 : vector<16xf32> to vector<16x1xf32>
    %14 = vector.shape_cast %7 : vector<1x128xi1> to vector<1x128xi1>
    %15 = vector.broadcast %14 : vector<1x128xi1> to vector<16x128xi1>
    %16 = vector.shape_cast %13 : vector<16x1xf32> to vector<16x1xf32>
    %17 = vector.broadcast %16 : vector<16x1xf32> to vector<16x128xf32>
    %18 = arith.select %15, %17, %0 : vector<16x128xi1>, vector<16x128xf32>
    %c1_5 = arith.constant 1 : index
    %c0_6 = arith.constant 0 : index
    %19 = memref.load %arg1[%c1_5, %c0_6] : memref<6x2xi32, #tpu.memory_space<smem>>
    %c1_7 = arith.constant 1 : index
    %c1_8 = arith.constant 1 : index
    %20 = memref.load %arg1[%c1_7, %c1_8] : memref<6x2xi32, #tpu.memory_space<smem>>
    %21 = vector.broadcast %20 : i32 to vector<1x128xi32>
    %22 = arith.cmpi eq, %1, %21 : vector<1x128xi32>
    %23 = vector.broadcast %19 : i32 to vector<1x128xi32>
    %24 = arith.cmpi eq, %1, %23 : vector<1x128xi32>
    %cst_9 = arith.constant 0.000000e+00 : f32
    %25 = vector.shape_cast %22 : vector<1x128xi1> to vector<1x128xi1>
    %26 = vector.broadcast %25 : vector<1x128xi1> to vector<16x128xi1>
    %27 = vector.broadcast %cst_9 : f32 to vector<16x128xf32>
    %28 = arith.select %26, %0, %27 : vector<16x128xi1>, vector<16x128xf32>
    %cst_10 = arith.constant dense<0.000000e+00> : vector<16xf32>
    %29 = vector.multi_reduction <add>, %28, %cst_10 [1] : vector<16x128xf32> to vector<16xf32>
    %30 = vector.shape_cast %29 : vector<16xf32> to vector<16x1xf32>
    %31 = vector.shape_cast %24 : vector<1x128xi1> to vector<1x128xi1>
    %32 = vector.broadcast %31 : vector<1x128xi1> to vector<16x128xi1>
    %33 = vector.shape_cast %30 : vector<16x1xf32> to vector<16x1xf32>
    %34 = vector.broadcast %33 : vector<16x1xf32> to vector<16x128xf32>
    %35 = arith.select %32, %34, %18 : vector<16x128xi1>, vector<16x128xf32>
    %c2 = arith.constant 2 : index
    %c0_11 = arith.constant 0 : index
    %36 = memref.load %arg1[%c2, %c0_11] : memref<6x2xi32, #tpu.memory_space<smem>>
    %c2_12 = arith.constant 2 : index
    %c1_13 = arith.constant 1 : index
    %37 = memref.load %arg1[%c2_12, %c1_13] : memref<6x2xi32, #tpu.memory_space<smem>>
    %38 = vector.broadcast %37 : i32 to vector<1x128xi32>
    %39 = arith.cmpi eq, %1, %38 : vector<1x128xi32>
    %40 = vector.broadcast %36 : i32 to vector<1x128xi32>
    %41 = arith.cmpi eq, %1, %40 : vector<1x128xi32>
    %cst_14 = arith.constant 0.000000e+00 : f32
    %42 = vector.shape_cast %39 : vector<1x128xi1> to vector<1x128xi1>
    %43 = vector.broadcast %42 : vector<1x128xi1> to vector<16x128xi1>
    %44 = vector.broadcast %cst_14 : f32 to vector<16x128xf32>
    %45 = arith.select %43, %0, %44 : vector<16x128xi1>, vector<16x128xf32>
    %cst_15 = arith.constant dense<0.000000e+00> : vector<16xf32>
    %46 = vector.multi_reduction <add>, %45, %cst_15 [1] : vector<16x128xf32> to vector<16xf32>
    %47 = vector.shape_cast %46 : vector<16xf32> to vector<16x1xf32>
    %48 = vector.shape_cast %41 : vector<1x128xi1> to vector<1x128xi1>
    %49 = vector.broadcast %48 : vector<1x128xi1> to vector<16x128xi1>
    %50 = vector.shape_cast %47 : vector<16x1xf32> to vector<16x1xf32>
    %51 = vector.broadcast %50 : vector<16x1xf32> to vector<16x128xf32>
    %52 = arith.select %49, %51, %35 : vector<16x128xi1>, vector<16x128xf32>
    %c3 = arith.constant 3 : index
    %c0_16 = arith.constant 0 : index
    %53 = memref.load %arg1[%c3, %c0_16] : memref<6x2xi32, #tpu.memory_space<smem>>
    %c3_17 = arith.constant 3 : index
    %c1_18 = arith.constant 1 : index
    %54 = memref.load %arg1[%c3_17, %c1_18] : memref<6x2xi32, #tpu.memory_space<smem>>
    %55 = vector.broadcast %54 : i32 to vector<1x128xi32>
    %56 = arith.cmpi eq, %1, %55 : vector<1x128xi32>
    %57 = vector.broadcast %53 : i32 to vector<1x128xi32>
    %58 = arith.cmpi eq, %1, %57 : vector<1x128xi32>
    %cst_19 = arith.constant 0.000000e+00 : f32
    %59 = vector.shape_cast %56 : vector<1x128xi1> to vector<1x128xi1>
    %60 = vector.broadcast %59 : vector<1x128xi1> to vector<16x128xi1>
    %61 = vector.broadcast %cst_19 : f32 to vector<16x128xf32>
    %62 = arith.select %60, %0, %61 : vector<16x128xi1>, vector<16x128xf32>
    %cst_20 = arith.constant dense<0.000000e+00> : vector<16xf32>
    %63 = vector.multi_reduction <add>, %62, %cst_20 [1] : vector<16x128xf32> to vector<16xf32>
    %64 = vector.shape_cast %63 : vector<16xf32> to vector<16x1xf32>
    %65 = vector.shape_cast %58 : vector<1x128xi1> to vector<1x128xi1>
    %66 = vector.broadcast %65 : vector<1x128xi1> to vector<16x128xi1>
    %67 = vector.shape_cast %64 : vector<16x1xf32> to vector<16x1xf32>
    %68 = vector.broadcast %67 : vector<16x1xf32> to vector<16x128xf32>
    %69 = arith.select %66, %68, %52 : vector<16x128xi1>, vector<16x128xf32>
    %c4 = arith.constant 4 : index
    %c0_21 = arith.constant 0 : index
    %70 = memref.load %arg1[%c4, %c0_21] : memref<6x2xi32, #tpu.memory_space<smem>>
    %c4_22 = arith.constant 4 : index
    %c1_23 = arith.constant 1 : index
    %71 = memref.load %arg1[%c4_22, %c1_23] : memref<6x2xi32, #tpu.memory_space<smem>>
    %72 = vector.broadcast %71 : i32 to vector<1x128xi32>
    %73 = arith.cmpi eq, %1, %72 : vector<1x128xi32>
    %74 = vector.broadcast %70 : i32 to vector<1x128xi32>
    %75 = arith.cmpi eq, %1, %74 : vector<1x128xi32>
    %cst_24 = arith.constant 0.000000e+00 : f32
    %76 = vector.shape_cast %73 : vector<1x128xi1> to vector<1x128xi1>
    %77 = vector.broadcast %76 : vector<1x128xi1> to vector<16x128xi1>
    %78 = vector.broadcast %cst_24 : f32 to vector<16x128xf32>
    %79 = arith.select %77, %0, %78 : vector<16x128xi1>, vector<16x128xf32>
    %cst_25 = arith.constant dense<0.000000e+00> : vector<16xf32>
    %80 = vector.multi_reduction <add>, %79, %cst_25 [1] : vector<16x128xf32> to vector<16xf32>
    %81 = vector.shape_cast %80 : vector<16xf32> to vector<16x1xf32>
    %82 = vector.shape_cast %75 : vector<1x128xi1> to vector<1x128xi1>
    %83 = vector.broadcast %82 : vector<1x128xi1> to vector<16x128xi1>
    %84 = vector.shape_cast %81 : vector<16x1xf32> to vector<16x1xf32>
    %85 = vector.broadcast %84 : vector<16x1xf32> to vector<16x128xf32>
    %86 = arith.select %83, %85, %69 : vector<16x128xi1>, vector<16x128xf32>
    %c5 = arith.constant 5 : index
    %c0_26 = arith.constant 0 : index
    %87 = memref.load %arg1[%c5, %c0_26] : memref<6x2xi32, #tpu.memory_space<smem>>
    %c5_27 = arith.constant 5 : index
    %c1_28 = arith.constant 1 : index
    %88 = memref.load %arg1[%c5_27, %c1_28] : memref<6x2xi32, #tpu.memory_space<smem>>
    %89 = vector.broadcast %88 : i32 to vector<1x128xi32>
    %90 = arith.cmpi eq, %1, %89 : vector<1x128xi32>
    %91 = vector.broadcast %87 : i32 to vector<1x128xi32>
    %92 = arith.cmpi eq, %1, %91 : vector<1x128xi32>
    %cst_29 = arith.constant 0.000000e+00 : f32
    %93 = vector.shape_cast %90 : vector<1x128xi1> to vector<1x128xi1>
    %94 = vector.broadcast %93 : vector<1x128xi1> to vector<16x128xi1>
    %95 = vector.broadcast %cst_29 : f32 to vector<16x128xf32>
    %96 = arith.select %94, %0, %95 : vector<16x128xi1>, vector<16x128xf32>
    %cst_30 = arith.constant dense<0.000000e+00> : vector<16xf32>
    %97 = vector.multi_reduction <add>, %96, %cst_30 [1] : vector<16x128xf32> to vector<16xf32>
    %98 = vector.shape_cast %97 : vector<16xf32> to vector<16x1xf32>
    %99 = vector.shape_cast %92 : vector<1x128xi1> to vector<1x128xi1>
    %100 = vector.broadcast %99 : vector<1x128xi1> to vector<16x128xi1>
    %101 = vector.shape_cast %98 : vector<16x1xf32> to vector<16x1xf32>
    %102 = vector.broadcast %101 : vector<16x1xf32> to vector<16x128xf32>
    %103 = arith.select %100, %102, %86 : vector<16x128xi1>, vector<16x128xf32>
    %c0_31 = arith.constant 0 : index
    %c0_32 = arith.constant 0 : index
    %104 = vector.load %arg3[%c0_31, %c0_32] : memref<16x128xf32, #tpu.memory_space<vmem>>, vector<16x128xf32>
    tpu.vector_store %arg3[%c0_31, %c0_32], %103 {strides = array<i32>} : memref<16x128xf32, #tpu.memory_space<vmem>>, vector<16x128xf32>,
    return
  }
  func.func @transform_0(%arg0: i32, %arg1: memref<6x2xi32, #tpu.memory_space<smem>>) -> (i32, i32) {
    %c0_i32 = arith.constant 0 : i32
    %c0_i32_0 = arith.constant 0 : i32
    return %arg0, %c0_i32 : i32, i32
  }
  func.func @transform_1(%arg0: i32, %arg1: memref<6x2xi32, #tpu.memory_space<smem>>) -> (i32, i32) {
    %c0_i32 = arith.constant 0 : i32
    %c0_i32_0 = arith.constant 0 : i32
    return %arg0, %c0_i32 : i32, i32
  }
}

</mosaic_0001>

<bundles_post_ra>
// kernel: tpu_custom_call.1
= control target key start
LH: loop header
LB: loop body
LE: loop exit
PB: predicated region body
PF: predicated region fallthrough
CT: control target
= control target key end

     0   :  { %s249_s12 = smov [#allocation3]   ;;  %s347_s0 = inlined_call_operand.vmem [shape: s32[6,2], index: 0, kind: input, shape index: {}]   ;;  %s348_s1 = inlined_call_operand.hbm [shape: f32[16,128], index: 1, kind: input, shape index: {}]   ;;  %s349_s2 = inlined_call_operand.hbm [shape: f32[16,128], index: 2, kind: output, shape index: {}]  }
   0x1   :  { %s8_s11 = sshll.u32 %s347_s0, 4  ;;  %s9_s11 = int_to_ptr.vmem [resolvable:$true] %s8_s11 }
   0x2   :  { %11 = dma.vmem_to_smem %s9_s11, 128, %s249_s12, [#allocation2] }
   0x3   :  { %243 = dma.done.wait [#allocation2], 128 }
   0x4   :  { %244 = vsyncadd [#allocation2], 4294967168 }
   0x5   :  { %14 = sfence }
   0x6   :  { %15 = vsyncpa [#allocation5], 0 }
   0x7   :  { %16 = vsyncpa [#allocation6], 0  ;;  %s21_s15 = sshll.u32 %s348_s1, 4  ;;  %s250_s16 = smov [#allocation4]   ;;  %s22_s15 = int_to_ptr.hbm [resolvable:$true] %s21_s15 }
   0x8   :  { %s23_s17 = sshll.u32 %s250_s16, 4  ;;  %s251_s18 = smov 128   ;;  %s24_s17 = int_to_ptr.vmem [resolvable:$true] %s23_s17 }
   0x9   :  { %s252_s19 = smov 8  }
   0xa   :  { %29 = dma.hbm_to_vmem [thread:$0]  %s22_s15, 256, %s24_s17, [#allocation5], %s251_s18, %s251_s18, %s252_s19  }
   0xb   :  { %245 = dma.done.wait [#allocation5], 256  }
   0xc   :  { %246 = vsyncadd [#allocation5], 4294967040  ;;  %v36_v0 = vlaneseq  ;;  %s169_s0 = sld [smem:[#allocation3 + $0x81]]  ;;  %v280_v2 = vld [vmem:[#allocation4] sm:$0xff]  ;;  %v35_v11 = vld [vmem:[#allocation4 + $0x8] sm:$0xff]  ;;  %s253_s30 = smov [#allocation7]  }
   0xd   :  { %s167_s20 = sld [smem:[#allocation3 + $0x1]]  ;;  %s152_s3 = sshll.u32 %s253_s30, 4  ;;  %s153_s3 = int_to_ptr.vmem [resolvable:$true] %s152_s3 }
   0xe   :  { %s171_s21 = sld [smem:[#allocation3 + $0x101]]  ;;  %v278_v1 = vand.u32 127, %v36_v0  ;;  %s154_s6 = sshll.u32 %s349_s2, 4  ;;  %s155_s6 = int_to_ptr.hbm [resolvable:$true] %s154_s6 }
   0xf   :  { %s173_s1 = sld [smem:[#allocation3 + $0x181]] }
  0x10   :  { %s175_s22 = sld [smem:[#allocation3 + $0x201]] }
  0x11   :  { %s177_s23 = sld [smem:[#allocation3 + $0x281]] }
  0x12   :  { %v58_v3 = vstv %s169_s0  ;;  %s38_s24 = sld [smem:[#allocation3]] }
  0x13   :  { %vm283_vm0 = vcmp.eq.s32.totalorder %v278_v1, %v58_v3  ;;  %v40_v5 = vstv %s167_s20  ;;  %s168_s25 = sld [smem:[#allocation3 + $0x80]] }
  0x14   :  { %v64_v6 = vsel %vm283_vm0, %v280_v2, 0.0  ;;  %vm291_vm1 = vcmp.eq.s32.totalorder %v278_v1, %v40_v5  ;;  %v76_v8 = vstv %s171_s21  ;;  %v65_v12 = vsel %vm283_vm0, %v35_v11, 0.0  ;;  %s170_s26 = sld [smem:[#allocation3 + $0x100]] }
  0x15   :  { %66 = vadd.xlane.f32.xlu1 %v64_v6  ;;  %v46_v9 = vsel %vm291_vm1, %v280_v2, 0.0  ;;  %vm77_vm2 = vcmp.eq.s32.totalorder %v278_v1, %v76_v8  ;;  %v47_v13 = vsel %vm291_vm1, %v35_v11, 0.0  ;;  %v94_v15 = vstv %s173_s1  ;;  %s172_s27 = sld [smem:[#allocation3 + $0x180]] }
  0x16   :  { %48 = vadd.xlane.f32.xlu0 %v46_v9  ;;  %v82_v10 = vsel %vm77_vm2, %v280_v2, 0.0  ;;  %v83_v14 = vsel %vm77_vm2, %v35_v11, 0.0  ;;  %v112_v16 = vstv %s175_s22  ;;  %vm95_vm3 = vcmp.eq.s32.totalorder %v278_v1, %v94_v15  ;;  %s174_s28 = sld [smem:[#allocation3 + $0x200]] }
  0x17   :  { %84 = vadd.xlane.f32.xlu2 %v82_v10  ;;  %vm113_vm4 = vcmp.eq.s32.totalorder %v278_v1, %v112_v16  ;;  %v101_v17 = vsel %vm95_vm3, %v35_v11, 0.0  ;;  %v100_v18 = vsel %vm95_vm3, %v280_v2, 0.0  ;;  %v130_v20 = vstv %s177_s23  ;;  %s176_s29 = sld [smem:[#allocation3 + $0x280]] }
  0x18   :  { %v118_v19 = vsel %vm113_vm4, %v280_v2, 0.0  ;;  %vm131_vm5 = vcmp.eq.s32.totalorder %v278_v1, %v130_v20  ;;  %v119_v22 = vsel %vm113_vm4, %v35_v11, 0.0  ;;  %v42_v27 = vstv %s38_s24 }
  0x19   :  { %v136_v21 = vsel %vm131_vm5, %v280_v2, 0.0  ;;  %v137_v23 = vsel %vm131_vm5, %v35_v11, 0.0  ;;  %vm311_vm6 = vcmp.eq.s32.totalorder %v278_v1, %v42_v27  ;;  %v60_v32 = vstv %s168_s25 }
  0x1a   :  { %vm61_vm7 = vcmp.eq.s32.totalorder %v278_v1, %v60_v32  ;;  %v78_v34 = vstv %s170_s26 }
  0x1b   :  { %v96_v35 = vstv %s172_s27  ;;  %vm320_vm8 = vcmp.eq.s32.totalorder %v278_v1, %v78_v34 }
  0x1c   :  { %vm97_vm9 = vcmp.eq.s32.totalorder %v278_v1, %v96_v35  ;;  %v114_v41 = vstv %s174_s28 }
  0x1d   :  { %68 = vadd.xlane.f32.xlu1 %v65_v12  ;;  %v132_v43 = vstv %s176_s29  ;;  %vm330_vm10 = vcmp.eq.s32.totalorder %v278_v1, %v114_v41 }
  0x1e   :  { %50 = vadd.xlane.f32.xlu0 %v47_v13  ;;  %vm133_vm11 = vcmp.eq.s32.totalorder %v278_v1, %v132_v43 }
  0x1f   :  { %86 = vadd.xlane.f32.xlu2 %v83_v14 }
  0x25   :  { %104 = vadd.xlane.f32.xlu1 %v101_v17 }
  0x26   :  { %102 = vadd.xlane.f32.xlu0 %v100_v18 }
  0x27   :  { %120 = vadd.xlane.f32.xlu2 %v118_v19 }
  0x2d   :  { %138 = vadd.xlane.f32.xlu1 %v136_v21 }
  0x2e   :  { %122 = vadd.xlane.f32.xlu0 %v119_v22 }
  0x2f   :  { %140 = vadd.xlane.f32.xlu2 %v137_v23 }
  0x88   :  { %v67_v24 = vpop.xlane.xlu1 %66 }
  0x89   :  { %v49_v25 = vpop.xlane.xlu0 %48 }
  0x8a   :  { %v85_v26 = vpop.xlane.xlu2 %84  ;;  %v54_v33 = vsel %vm311_vm6, %v49_v25, %v280_v2 }
  0x8b   :  { %v72_v38 = vsel %vm61_vm7, %v67_v24, %v54_v33 }
  0x8c   :  { %v90_v44 = vsel %vm320_vm8, %v85_v26, %v72_v38 }
  0x90   :  { %v69_v28 = vpop.xlane.xlu1 %68 }
  0x91   :  { %v51_v29 = vpop.xlane.xlu0 %50 }
  0x92   :  { %v87_v30 = vpop.xlane.xlu2 %86  ;;  %v55_v40 = vsel %vm311_vm6, %v51_v29, %v35_v11 }
  0x93   :  { %v73_v45 = vsel %vm61_vm7, %v69_v28, %v55_v40 }
  0x94   :  { %v91_v48 = vsel %vm320_vm8, %v87_v30, %v73_v45 }
  0x98   :  { %v105_v36 = vpop.xlane.xlu1 %104 }
  0x99   :  { %v103_v39 = vpop.xlane.xlu0 %102  ;;  %v109_v51 = vsel %vm97_vm9, %v105_v36, %v91_v48 }
  0x9a   :  { %v121_v42 = vpop.xlane.xlu2 %120  ;;  %v108_v46 = vsel %vm97_vm9, %v103_v39, %v90_v44 }
  0x9b   :  { %v126_v49 = vsel %vm330_vm10, %v121_v42, %v108_v46 }
  0xa0   :  { %v139_v50 = vpop.xlane.xlu1 %138 }
  0xa1   :  { %v144_v52 = vsel %vm133_vm11, %v139_v50, %v126_v49  ;;  %v123_v53 = vpop.xlane.xlu0 %122 }
  0xa2   :  { %146 = vst [vmem:[#allocation7] sm:$0xff] %v144_v52  ;;  %v127_v54 = vsel %vm330_vm10, %v123_v53, %v109_v51  ;;  %v141_v55 = vpop.xlane.xlu2 %140 }
  0xa3   :  { %v145_v56 = vsel %vm133_vm11, %v141_v55, %v127_v54 }
  0xa4   :  { %147 = vst [vmem:[#allocation7 + $0x8] sm:$0xff] %v145_v56 }
  0xa5   :  { %160 = dma.vmem_to_hbm [thread:$0]  %s153_s3, 256, %s155_s6, [#allocation6], %s251_s18, %s251_s18, %s252_s19  }
  0xa6   :  { %247 = dma.done.wait [#allocation6], 256  }
  0xa7   :  { %248 = vsyncadd [#allocation6], 4294967040 }
  0xa8   :  { %165 = vsyncpa [#allocation5], 1 }
  0xa9   :  { %166 = vsyncpa [#allocation6], 1 }

</bundles_post_ra>
